<compile_context>
chip_gen: v7x
topology: tpu7x:2x2x1
jax: 0.10.0
libtpu: 0.0.40
codegen_flags: <defaults>
</compile_context>

<pallas_src>
import jax
import jax.numpy as jnp
from jax.experimental import pallas as pl
from jax.experimental.pallas import tpu as pltpu


# 32768 rows * 32 f32 = 4 MiB per Cs buffer, 8 MiB double-buffered (+ ~0.5 MiB
# of output buffers) — comfortably inside the scoped-VMEM default on v5e
# (16 MiB), v6e (32 MiB) and v7x (32 MiB), and big enough that the per-step
# DMA time dominates the ~0.35 us grid-step overhead even at v7x's 3.2 TB/s.
_TILE_CAP = 32768


def _judge_kernel(bias_ref, cs_ref, w_ref, o_ref):
    """One (batch b, candidate-tile j) grid step.

    bias_ref: (1, 1, 2)       f32 per-batch bias = mean(Ks_b, -2) @ W
    cs_ref:   (1, TILE_N, D)  candidate rows for this tile
    w_ref:    (D, 2)          projection weights (shared across the grid)
    o_ref:    (1, TILE_N, 2)  output block
    """
    acc = jnp.dot(cs_ref[0], w_ref[...], preferred_element_type=jnp.float32)
    o_ref[0] = (acc - bias_ref[0]).astype(o_ref.dtype)


def _pick_tile_n(n, batch, cap=_TILE_CAP):
    """Choose (tile_n, padded_n).

    Legality: the Cs / output blocks have tile_n as their second-to-last dim,
    so tile_n must be a multiple of 128 or equal to the (padded) full N, and
    must divide the padded N exactly.
    """
    if n <= cap:
        tile = n
        # Megacore guard (v7x): with B == 1 a single full-N tile leaves one
        # TensorCore idle; split N so the "parallel" grid has >= 2 steps.
        if batch == 1 and n >= 256 and n % 256 == 0:
            tile = n // 2
        return tile, n

    # Largest multiple-of-128 divisor of n that is <= cap (no padding needed).
    t = (cap // 128) * 128
    while t >= 128:
        if n % t == 0:
            return t, n
        t -= 128

    # No suitable divisor: pad N up to a tile multiple rather than falling
    # back to a single full-N tile (VMEM blow-up risk, worst on v7x).
    t = (cap // 128) * 128
    return t, ((n + t - 1) // t) * t


def pul2_judge_forward(Ks, Cs, linear, *, tile_n=None):
    """Pallas implementation of Pul2JudgeNet.forward.

    Ks:     (B, n_keys, D)
    Cs:     (B, n_candidates, D)
    linear: (D, 2)
    returns (B, n_candidates, 2) in Cs' dtype.
    """
    B, K, D = Ks.shape
    Bc, N, Dc = Cs.shape
    assert B == Bc and D == Dc, (Ks.shape, Cs.shape)
    assert linear.shape == (D, 2), linear.shape

    out_dtype = Cs.dtype

    # Tiny per-batch bias in f32:  bias_b = mean(Ks_b, axis=-2) @ linear.
    # (Computed as sum/K after the contraction; always f32 for precision.)
    bias = jnp.einsum(
        "bkd,dc->bc",
        Ks.astype(jnp.float32),
        linear.astype(jnp.float32),
        preferred_element_type=jnp.float32,
    ) / jnp.float32(K)
    bias = bias.reshape(B, 1, 2)

    # Keep the MXU input dtype matched to Cs (no wrapper cast of Cs itself).
    w = linear.astype(Cs.dtype)

    if tile_n is None:
        tile_n, n_pad = _pick_tile_n(N, B)
    else:
        n_pad = ((N + tile_n - 1) // tile_n) * tile_n
    assert tile_n == n_pad or tile_n % 128 == 0, tile_n
    assert n_pad % tile_n == 0, (n_pad, tile_n)

    cs = Cs
    if n_pad != N:
        cs = jnp.pad(Cs, ((0, 0), (0, n_pad - N), (0, 0)))

    grid = (B, n_pad // tile_n)

    out = pl.pallas_call(
        _judge_kernel,
        out_shape=jax.ShapeDtypeStruct((B, n_pad, 2), out_dtype),
        grid_spec=pltpu.PrefetchScalarGridSpec(
            num_scalar_prefetch=0,
            grid=grid,
            in_specs=[
                pl.BlockSpec((1, 1, 2), lambda b, j: (b, 0, 0)),       # bias
                pl.BlockSpec((1, tile_n, D), lambda b, j: (b, j, 0)),  # Cs tile
                pl.BlockSpec((D, 2), lambda b, j: (0, 0)),             # weights
            ],
            out_specs=pl.BlockSpec((1, tile_n, 2), lambda b, j: (b, j, 0)),
        ),
        compiler_params=pltpu.CompilerParams(
            dimension_semantics=("parallel", "parallel"),
        ),
    )(bias, cs, w)

    if n_pad != N:
        out = out[:, :N, :]
    return out


def init_params(key, word_vec_dim):
    """xavier_normal_-style init of `linear` (word_vec_dim, 2)."""
    # torch xavier_normal_ on a 2-D (D, 2) tensor: fan_in = 2, fan_out = D.
    fan_in = 2
    fan_out = word_vec_dim
    std = (2.0 / (fan_in + fan_out)) ** 0.5
    return std * jax.random.normal(key, (word_vec_dim, 2), dtype=jnp.float32)


if __name__ == "__main__":
    key = jax.random.PRNGKey(0)
    k_lin, k_K, k_C = jax.random.split(key, 3)

    # Small, module-consistent shapes.
    word_vec_dim = 32
    batch = 2
    n_keys = 8
    n_candidates = 16

    linear = init_params(k_lin, word_vec_dim)
    Ks = jax.random.normal(k_K, (batch, n_keys, word_vec_dim), dtype=jnp.float32)
    Cs = jax.random.normal(k_C, (batch, n_candidates, word_vec_dim), dtype=jnp.float32)

    out = jax.block_until_ready(pul2_judge_forward(Ks, Cs, linear))

    # Plain-JAX reference (same semantics as the torch module).
    center = jnp.mean(Ks, axis=-2, keepdims=True)
    ref = jnp.tensordot(Cs - center, linear, axes=([-1], [-2]))

    assert out.shape == (batch, n_candidates, 2), out.shape
    assert out.dtype == Cs.dtype, out.dtype
    assert jnp.allclose(out, ref, atol=1e-5, rtol=1e-5), float(
        jnp.max(jnp.abs(out - ref))
    )

    print("KERNEL_OK")
</pallas_src>

<mosaic_0001>
module attributes {stable_mosaic.version = 11 : i64} {
  func.func @_judge_kernel(%arg0: i32, %arg1: i32, %arg2: memref<1x1x2xf32, #tpu.memory_space<vmem>>, %arg3: memref<1x16x32xf32, #tpu.memory_space<vmem>>, %arg4: memref<32x2xf32, #tpu.memory_space<vmem>>, %arg5: memref<1x16x2xf32, #tpu.memory_space<vmem>>) attributes {dimension_semantics = [#tpu.dimension_semantics<parallel>, #tpu.dimension_semantics<parallel>], iteration_bounds = array<i64: 2, 1>, scalar_prefetch = 0 : i64, scratch_operands = 0 : i64, tpu.core_type = #tpu.core_type<tc>, window_params = [{transform_indices = @transform_0, window_bounds = array<i64: 1, 1, 2>}, {transform_indices = @transform_1, window_bounds = array<i64: 1, 16, 32>}, {pipeline_mode = #tpu.pipeline_mode<synchronous>, transform_indices = @transform_2, window_bounds = array<i64: 32, 2>}, {transform_indices = @transform_3, window_bounds = array<i64: 1, 16, 2>}]} {
    %c0 = arith.constant 0 : index
    %c0_0 = arith.constant 0 : index
    %c0_1 = arith.constant 0 : index
    %0 = vector.load %arg3[%c0, %c0_0, %c0_1] : memref<1x16x32xf32, #tpu.memory_space<vmem>>, vector<1x16x32xf32>
    %1 = vector.shape_cast %0 : vector<1x16x32xf32> to vector<16x32xf32>
    %c0_2 = arith.constant 0 : index
    %c0_3 = arith.constant 0 : index
    %2 = vector.load %arg4[%c0_2, %c0_3] : memref<32x2xf32, #tpu.memory_space<vmem>>, vector<32x2xf32>
    %cst = arith.constant dense<0.000000e+00> : vector<16x2xf32>
    %3 = tpu.matmul %1, %2, %cst {dimension_numbers = #tpu.dot_dimension_numbers<[1], [0], [0], [1], [0, 0, 1, 1], [], []>} : vector<16x32xf32>, vector<32x2xf32>, vector<16x2xf32> -> vector<16x2xf32>
    %c0_4 = arith.constant 0 : index
    %c0_5 = arith.constant 0 : index
    %c0_6 = arith.constant 0 : index
    %4 = vector.load %arg2[%c0_4, %c0_5, %c0_6] : memref<1x1x2xf32, #tpu.memory_space<vmem>>, vector<1x1x2xf32>
    %5 = vector.shape_cast %4 : vector<1x1x2xf32> to vector<1x2xf32>
    %6 = vector.broadcast %5 : vector<1x2xf32> to vector<16x2xf32>
    %7 = arith.subf %3, %6 : vector<16x2xf32>
    %c0_7 = arith.constant 0 : index
    %c0_8 = arith.constant 0 : index
    %c0_9 = arith.constant 0 : index
    %8 = vector.load %arg5[%c0_7, %c0_8, %c0_9] : memref<1x16x2xf32, #tpu.memory_space<vmem>>, vector<1x16x2xf32>
    %9 = vector.shape_cast %8 : vector<1x16x2xf32> to vector<16x2xf32>
    %10 = vector.shape_cast %7 : vector<16x2xf32> to vector<1x16x2xf32>
    tpu.vector_store %arg5[%c0_7, %c0_8, %c0_9], %10 {strides = array<i32>} : memref<1x16x2xf32, #tpu.memory_space<vmem>>, vector<1x16x2xf32>,
    return
  }
  func.func @transform_0(%arg0: i32, %arg1: i32) -> (i32, i32, i32) {
    %c0_i32 = arith.constant 0 : i32
    %c0_i32_0 = arith.constant 0 : i32
    %c0_i32_1 = arith.constant 0 : i32
    return %arg0, %c0_i32, %c0_i32_0 : i32, i32, i32
  }
  func.func @transform_1(%arg0: i32, %arg1: i32) -> (i32, i32, i32) {
    %c0_i32 = arith.constant 0 : i32
    %c0_i32_0 = arith.constant 0 : i32
    return %arg0, %arg1, %c0_i32 : i32, i32, i32
  }
  func.func @transform_2(%arg0: i32, %arg1: i32) -> (i32, i32) {
    %c0_i32 = arith.constant 0 : i32
    %c0_i32_0 = arith.constant 0 : i32
    %c0_i32_1 = arith.constant 0 : i32
    return %c0_i32, %c0_i32_0 : i32, i32
  }
  func.func @transform_3(%arg0: i32, %arg1: i32) -> (i32, i32, i32) {
    %c0_i32 = arith.constant 0 : i32
    %c0_i32_0 = arith.constant 0 : i32
    return %arg0, %arg1, %c0_i32 : i32, i32, i32
  }
}

</mosaic_0001>

<bundles_post_ra>
// kernel: tpu_custom_call.1
= control target key start
LH: loop header
LB: loop body
LE: loop exit
PB: predicated region body
PF: predicated region fallthrough
CT: control target
= control target key end

     0   :  { %s529_s12 = smov 0   ;;  %s531_s13 = smov 0   ;;  %s577_s0 = inlined_call_operand.vmem [shape: f32[2,1,2], index: 0, kind: input, shape index: {}]   ;;  %s578_s1 = inlined_call_operand.vmem [shape: f32[2,16,32], index: 1, kind: input, shape index: {}]   ;;  %s579_s2 = inlined_call_operand.vmem [shape: f32[32,2], index: 2, kind: input, shape index: {}]   ;;  %s580_s3 = inlined_call_operand.vmem [shape: f32[2,16,2], index: 3, kind: output, shape index: {}]  }
   0x1   :  { %s533_s14 = smov 0  }
   0x2 LB: > { %s25_s15 = sadd.s32 1, %s503_s13  ;;  %p424_p0 = scmp.ge.s32.totalorder %s507_s14, 1  ;;  %s507_s14 = sphi %s533_s14, %s13_s14   ;;  %s503_s13 = sphi %s531_s13, %s582_s13   ;;  %s499_s12 = sphi %s529_s12, %s581_s12  }
   0x3   : > { %p27_p1 = scmp.ge.s32.totalorder %s25_s15, 2  ;;  %p166_p2 = scmp.lt.s32.totalorder %s507_s14, 3 }
   0x5   : > { %s584_s15 = smov (%p27_p1, %s25_s15), 0  ;;  %p167_p3 = pnand %p424_p0, %p166_p2 }
   0x6   : > { %v226_v0 = vld [vmem:[%s579_s2] sm:$0xff] (!%p167_p3)  ;;  %v227_v1 = vld [vmem:[%s579_s2 + $0x8] sm:$0xff] (!%p167_p3)  ;;  %v228_v2 = vld [vmem:[%s579_s2 + $0x10] sm:$0xff] (!%p167_p3)  ;;  %p201_p4 = scmp.lt.s32.totalorder (!%p167_p3), %s499_s12, 1  ;;  %vm230_vm0 = vcmask (!%p167_p3), 261120   ;;  %vm321_vm1 = vcmask (!%p167_p3), 15360  }
   0x7   : > { %170 = sbr.rel (%p167_p3) target bundleno = 235 (0xeb), region = 32  ;;  %v453_v3 = vpack.c.bf16 (!%p167_p3), %v227_v1, %v226_v0  ;;  %v229_v4 = vld [vmem:[%s579_s2 + $0x18] sm:$0xff] (!%p167_p3) }
   0x8   : > { %v457_v5 = vpack.c.bf16 (!%p167_p3), %v229_v4, %v228_v2 }
   0x9   : > { %454 = vmatprep.subr.bf16.mxu0 (!%p167_p3), %v453_v3 }
   0xa   : > { %456 = vmatpush3.bf16.msra.mxu0 (!%p167_p3), %v453_v3 }
   0xb   : > { %458 = vmatprep.subr.bf16.mxu0 (!%p167_p3), %v457_v5 }
   0xe   : > { %s586_s12 = smov (!%p201_p4, %s499_s12), 1  ;;  %460 = vmatpush3.bf16.msra.mxu0 %v457_v5 }
   0xf   : > { %s434_s24 = sshll.u32 %s586_s12, 4  ;;  %s203_s30 = scalar_lea.vmem %s577_s0, %s586_s12 }
  0x10   : > { %s212_s27 = scalar_lea.vmem %s578_s1, %s434_s24  ;;  %v431_v8 = vld [vmem:[%s203_s30] ss:$0 sm:$0xff]  ;;  %s222_s6 = scalar_lea.vmem %s580_s3, %s434_s24 }
  0x11   : > { %v224_v6 = vld [vmem:[%s212_s27] sm:$0xff]  ;;  %v225_v7 = vld [vmem:[%s212_s27 + $0x8] sm:$0xff] }
  0x12   : > { %450 = vmatprep.mubr.msk.f32.mxu0 %vm230_vm0, %v224_v6 }
  0x13   : > { %451 = vmatmul.mubr.msk.f32.vlgmr.msra.gmra.mrb[0].mxu0 %vm230_vm0, %v225_v7 }
  0xe6   : > { %v452_v9 = vpop.f32.mrb[0].mxu0 }
  0xe7   : > { %v320_v10 = vsub.f32 %v452_v9, %v431_v8  ;;  %v303_v11 = vpop.f32.mrb[1].mxu0 }
  0xe8   : > { %v319_v12 = vsub.f32 %v303_v11, %v431_v8 }
  0xe9   : > { %323 = vst.msk [vmem:[%s222_s6 + $0x8] sm:$0xff] %vm321_vm1, %v320_v10 }
  0xea   : > { %322 = vst.msk [vmem:[%s222_s6] sm:$0xff] %vm321_vm1, %v319_v12 }
  0xeb PF: > { %s13_s14 = sadd.s32 1, %s507_s14   ;;  %s581_s12 = smov %s503_s13 }
  0xec   : > { %p10_p5 = scmp.ge.s32.totalorder %s13_s14, 4   ;;  %s582_s13 = smov %s584_s15 }
  0xee   :  { %12 = sbr.rel (!%p10_p5) target bundleno = 2 (0x2), region = 65 }

</bundles_post_ra>
